<compile_context>
chip_gen: v7x
topology: tpu7x:2x2x1
jax: 0.10.0
libtpu: 0.0.40
codegen_flags: <defaults>
</compile_context>

<pallas_src>
import jax
import jax.numpy as jnp
from jax.experimental import pallas as pl
from jax.experimental.pallas import tpu as pltpu


def gated_cnn_classifier_kernel(x_ref, wab_ref, wc_ref, bc_ref, out_ref):
    # x_ref  : (TB, L, K*H) bf16   im2col'd embedded activation for TB samples
    # wab_ref: (K*H, 2H)    bf16   fused conv||gate weight (taps along contraction)
    # wc_ref : (H, CP)      bf16   classifier weight, lane-padded to CP=128
    # bc_ref : (1, CP)      f32    classifier bias, lane-padded
    # out_ref: (TB, CP)     f32    logits, lane-dense padded block
    TB, L, KH = x_ref.shape
    H = wab_ref.shape[1] // 2

    # Fused conv + gate: one MXU matmul with contraction depth K*H; accumulation in
    # the MXU result buffer (no VMEM zero-init / read-modify-write scratch).
    x2 = x_ref[...].reshape(TB * L, KH)                                   # free reshape
    ab = jnp.dot(x2, wab_ref[...], preferred_element_type=jnp.float32)    # (TB*L, 2H)

    # GLU gating in f32 (v5e has no bf16 VPU/EUP); sigmoid runs on the EUP slot.
    gated = ab[:, :H] * jax.nn.sigmoid(ab[:, H:])                         # (TB*L, H)

    # MaxPool1d over the sequence.
    pooled = jnp.max(gated.reshape(TB, L, H), axis=1)                     # (TB, H)

    # Classifier into a lane-dense 128-wide padded block (unmasked vst).
    logits = jnp.dot(pooled.astype(wc_ref.dtype), wc_ref[...],
                     preferred_element_type=jnp.float32) + bc_ref[...]
    out_ref[...] = logits.astype(out_ref.dtype)


def torch_model_forward(x_tokens, params, *, kernel_size, block_b=8):
    """x_tokens: (B, L) int32. Returns (B, class_num) float32 logits (predict path)."""
    assert kernel_size % 2 == 1, "even kernel_size diverges from torch 'same' padding"
    emb, wa, wb, wc, bc = (params["emb"], params["wa"], params["wb"],
                           params["wc"], params["bc"])
    B, L = x_tokens.shape
    V, H = emb.shape
    C = wc.shape[1]
    K = kernel_size
    pad = (K - 1) // 2
    KH = K * H
    CP = 128                                  # lane-dense logits block width
    TB = block_b                              # samples per grid step
    B_pad = ((B + TB - 1) // TB) * TB

    # ---- host-side prep (cheap XLA ops; everything the kernel streams is bf16) ----
    # Real gather instead of in-kernel one-hot matmul; exact zero halo; im2col taps.
    x = jnp.take(emb.astype(jnp.bfloat16), x_tokens.astype(jnp.int32), axis=0)  # (B,L,H)
    xp = jnp.pad(x, ((0, B_pad - B), (pad, pad), (0, 0)))                        # (B_pad,L+2p,H)
    xim = jnp.concatenate([xp[:, k:k + L, :] for k in range(K)], axis=-1)        # (B_pad,L,K*H)

    # Fused conv||gate weight (K,H,H)+(K,H,H) -> (K*H, 2H); classifier lane-padded.
    wab = jnp.concatenate([wa, wb], axis=-1).reshape(KH, 2 * H).astype(jnp.bfloat16)
    wc_p = jnp.zeros((H, CP), jnp.bfloat16).at[:, :C].set(wc.astype(jnp.bfloat16))
    bc_p = jnp.zeros((1, CP), jnp.float32).at[:, :C].set(bc.astype(jnp.float32))

    # Explicit VMEM budget (double-buffered activation/output blocks + tiny weights
    # + f32 temporaries), clamped so it is safe on v5e/v6e/v7x scoped limits.
    act_blk = TB * L * KH * 2
    out_blk = TB * CP * 4
    wgt = KH * 2 * H * 2 + H * CP * 2 + CP * 4
    transients = TB * L * 2 * H * 4 * 3
    vmem_limit = int(min(max(2 * (act_blk + out_blk + wgt) + transients + (2 << 20),
                             4 << 20), 32 << 20))

    cost = pl.CostEstimate(
        flops=2 * B_pad * L * KH * 2 * H + 2 * B_pad * H * CP,
        transcendentals=B_pad * L * H,                      # sigmoid
        bytes_accessed=int(xim.size * 2 + wab.size * 2 + wc_p.size * 2
                           + bc_p.size * 4 + B_pad * CP * 4),
    )

    out = pl.pallas_call(
        gated_cnn_classifier_kernel,
        out_shape=jax.ShapeDtypeStruct((B_pad, CP), jnp.float32),
        grid=(B_pad // TB,),                                # TB samples per step
        in_specs=[
            pl.BlockSpec((TB, L, KH), lambda i: (i, 0, 0)),  # activation, tiled over batch
            pl.BlockSpec((KH, 2 * H), lambda i: (0, 0)),     # small resident weights
            pl.BlockSpec((H, CP), lambda i: (0, 0)),
            pl.BlockSpec((1, CP), lambda i: (0, 0)),
        ],
        out_specs=pl.BlockSpec((TB, CP), lambda i: (i, 0)),
        compiler_params=pltpu.CompilerParams(
            dimension_semantics=("parallel",),               # megacore sharding on v7x
            vmem_limit_bytes=vmem_limit),
        cost_estimate=cost,
    )(xim, wab, wc_p, bc_p)

    return out[:B, :C]


def reference_forward(x_tokens, params, *, kernel_size):
    """Pure-JAX reference with the same bf16 operand rounding as the kernel."""
    f32 = jnp.float32
    emb = params["emb"].astype(jnp.bfloat16).astype(f32)
    wa = params["wa"].astype(jnp.bfloat16).astype(f32)
    wb = params["wb"].astype(jnp.bfloat16).astype(f32)
    wc = params["wc"].astype(jnp.bfloat16).astype(f32)
    bc = params["bc"].astype(f32)
    K = kernel_size
    pad = (K - 1) // 2
    B, L = x_tokens.shape
    x = jnp.take(emb, x_tokens, axis=0)                               # (B, L, H)
    xp = jnp.pad(x, ((0, 0), (pad, pad), (0, 0)))
    a = sum(jnp.einsum("blh,ho->blo", xp[:, k:k + L], wa[k]) for k in range(K))
    b = sum(jnp.einsum("blh,ho->blo", xp[:, k:k + L], wb[k]) for k in range(K))
    g = a * jax.nn.sigmoid(b)
    pooled = jnp.max(g, axis=1)
    pooled = pooled.astype(jnp.bfloat16).astype(f32)                  # match kernel cast
    return pooled @ wc + bc


def init_params(key, *, vocab_size, hidden_size, kernel_size, class_num):
    V = vocab_size + 1          # matches `vocab_size = config['vocab_size'] + 1`
    H, K, C = hidden_size, kernel_size, class_num
    k1, k2, k3, k4, k5 = jax.random.split(key, 5)
    emb = jax.random.normal(k1, (V, H), jnp.float32) * 0.1
    emb = emb.at[0].set(0.0)    # padding_idx=0
    wa = jax.random.normal(k2, (K, H, H), jnp.float32) * 0.1   # (tap, in, out)
    wb = jax.random.normal(k3, (K, H, H), jnp.float32) * 0.1
    wc = jax.random.normal(k4, (H, C), jnp.float32) * 0.1
    bc = jax.random.normal(k5, (1, C), jnp.float32) * 0.1
    return {"emb": emb, "wa": wa, "wb": wb, "wc": wc, "bc": bc}


if __name__ == "__main__":
    config = dict(hidden_size=32, kernel_size=3, vocab_size=30,
                  class_num=5, max_length=8)

    key = jax.random.PRNGKey(0)
    pkey, xkey = jax.random.split(key)
    params = init_params(pkey,
                         vocab_size=config["vocab_size"],
                         hidden_size=config["hidden_size"],
                         kernel_size=config["kernel_size"],
                         class_num=config["class_num"])

    B, L = 2, config["max_length"]
    x_tokens = jax.random.randint(xkey, (B, L), 0, config["vocab_size"] + 1,
                                  dtype=jnp.int32)

    logits = torch_model_forward(x_tokens, params,
                                 kernel_size=config["kernel_size"])
    logits = jax.block_until_ready(logits)
    assert logits.shape == (B, config["class_num"])

    ref = reference_forward(x_tokens, params, kernel_size=config["kernel_size"])
    assert jnp.allclose(logits, ref, atol=2e-2, rtol=2e-2)

    print("KERNEL_OK")
</pallas_src>

<mosaic_0001>
module attributes {stable_mosaic.version = 11 : i64} {
  func.func @gated_cnn_classifier_kernel(%arg0: i32, %arg1: memref<8x8x96xbf16, #tpu.memory_space<vmem>>, %arg2: memref<96x64xbf16, #tpu.memory_space<vmem>>, %arg3: memref<32x128xbf16, #tpu.memory_space<vmem>>, %arg4: memref<1x128xf32, #tpu.memory_space<vmem>>, %arg5: memref<8x128xf32, #tpu.memory_space<vmem>>) attributes {dimension_semantics = [#tpu.dimension_semantics<parallel>], iteration_bounds = array<i64: 1>, scalar_prefetch = 0 : i64, scratch_operands = 0 : i64, tpu.core_type = #tpu.core_type<tc>, window_params = [{transform_indices = @transform_0, window_bounds = array<i64: 8, 8, 96>}, {pipeline_mode = #tpu.pipeline_mode<synchronous>, transform_indices = @transform_1, window_bounds = array<i64: 96, 64>}, {pipeline_mode = #tpu.pipeline_mode<synchronous>, transform_indices = @transform_2, window_bounds = array<i64: 32, 128>}, {pipeline_mode = #tpu.pipeline_mode<synchronous>, transform_indices = @transform_3, window_bounds = array<i64: 1, 128>}, {transform_indices = @transform_4, window_bounds = array<i64: 8, 128>}]} {
    %c0 = arith.constant 0 : index
    %c0_0 = arith.constant 0 : index
    %c0_1 = arith.constant 0 : index
    %0 = vector.load %arg1[%c0, %c0_0, %c0_1] : memref<8x8x96xbf16, #tpu.memory_space<vmem>>, vector<8x8x96xbf16>
    %1 = vector.shape_cast %0 : vector<8x8x96xbf16> to vector<64x96xbf16>
    %c0_2 = arith.constant 0 : index
    %c0_3 = arith.constant 0 : index
    %2 = vector.load %arg2[%c0_2, %c0_3] : memref<96x64xbf16, #tpu.memory_space<vmem>>, vector<96x64xbf16>
    %cst = arith.constant dense<0.000000e+00> : vector<64x64xf32>
    %3 = tpu.matmul %1, %2, %cst {dimension_numbers = #tpu.dot_dimension_numbers<[1], [0], [0], [1], [0, 0, 1, 1], [], []>} : vector<64x96xbf16>, vector<96x64xbf16>, vector<64x64xf32> -> vector<64x64xf32>
    %4 = vector.extract_strided_slice %3 {offsets = [0, 0], sizes = [64, 32], strides = [1, 1]} : vector<64x64xf32> to vector<64x32xf32>
    %5 = vector.extract_strided_slice %3 {offsets = [0, 32], sizes = [64, 32], strides = [1, 1]} : vector<64x64xf32> to vector<64x32xf32>
    %6 = arith.negf %5 : vector<64x32xf32>
    %7 = math.exp %6 : vector<64x32xf32>
    %cst_4 = arith.constant 1.000000e+00 : f32
    %8 = vector.broadcast %cst_4 : f32 to vector<64x32xf32>
    %9 = arith.addf %8, %7 : vector<64x32xf32>
    %10 = arith.divf %8, %9 : vector<64x32xf32>
    %11 = arith.mulf %4, %10 : vector<64x32xf32>
    %12 = vector.shape_cast %11 : vector<64x32xf32> to vector<8x8x32xf32>
    %cst_5 = arith.constant dense<0xFF800000> : vector<8x32xf32>
    %13 = vector.multi_reduction <maximumf>, %12, %cst_5 [1] : vector<8x8x32xf32> to vector<8x32xf32>
    %14 = arith.truncf %13 : vector<8x32xf32> to vector<8x32xbf16>
    %c0_6 = arith.constant 0 : index
    %c0_7 = arith.constant 0 : index
    %15 = vector.load %arg3[%c0_6, %c0_7] : memref<32x128xbf16, #tpu.memory_space<vmem>>, vector<32x128xbf16>
    %cst_8 = arith.constant dense<0.000000e+00> : vector<8x128xf32>
    %16 = tpu.matmul %14, %15, %cst_8 {dimension_numbers = #tpu.dot_dimension_numbers<[1], [0], [0], [1], [0, 0, 1, 1], [], []>} : vector<8x32xbf16>, vector<32x128xbf16>, vector<8x128xf32> -> vector<8x128xf32>
    %c0_9 = arith.constant 0 : index
    %c0_10 = arith.constant 0 : index
    %17 = vector.load %arg4[%c0_9, %c0_10] : memref<1x128xf32, #tpu.memory_space<vmem>>, vector<1x128xf32>
    %18 = vector.broadcast %17 : vector<1x128xf32> to vector<8x128xf32>
    %19 = arith.addf %16, %18 : vector<8x128xf32>
    %c0_11 = arith.constant 0 : index
    %c0_12 = arith.constant 0 : index
    %20 = vector.load %arg5[%c0_11, %c0_12] : memref<8x128xf32, #tpu.memory_space<vmem>>, vector<8x128xf32>
    tpu.vector_store %arg5[%c0_11, %c0_12], %19 {strides = array<i32>} : memref<8x128xf32, #tpu.memory_space<vmem>>, vector<8x128xf32>,
    return
  }
  func.func @transform_0(%arg0: i32) -> (i32, i32, i32) {
    %c0_i32 = arith.constant 0 : i32
    %c0_i32_0 = arith.constant 0 : i32
    %c0_i32_1 = arith.constant 0 : i32
    return %arg0, %c0_i32, %c0_i32_0 : i32, i32, i32
  }
  func.func @transform_1(%arg0: i32) -> (i32, i32) {
    %c0_i32 = arith.constant 0 : i32
    %c0_i32_0 = arith.constant 0 : i32
    %c0_i32_1 = arith.constant 0 : i32
    return %c0_i32, %c0_i32_0 : i32, i32
  }
  func.func @transform_2(%arg0: i32) -> (i32, i32) {
    %c0_i32 = arith.constant 0 : i32
    %c0_i32_0 = arith.constant 0 : i32
    %c0_i32_1 = arith.constant 0 : i32
    return %c0_i32, %c0_i32_0 : i32, i32
  }
  func.func @transform_3(%arg0: i32) -> (i32, i32) {
    %c0_i32 = arith.constant 0 : i32
    %c0_i32_0 = arith.constant 0 : i32
    %c0_i32_1 = arith.constant 0 : i32
    return %c0_i32, %c0_i32_0 : i32, i32
  }
  func.func @transform_4(%arg0: i32) -> (i32, i32) {
    %c0_i32 = arith.constant 0 : i32
    %c0_i32_0 = arith.constant 0 : i32
    return %arg0, %c0_i32 : i32, i32
  }
}

</mosaic_0001>

<bundles_post_ra>
// kernel: tpu_custom_call.1
= control target key start
LH: loop header
LB: loop body
LE: loop exit
PB: predicated region body
PF: predicated region fallthrough
CT: control target
= control target key end

     0   :  { %vm95_vm0 = vcmask 785408   ;;  %s702_s0 = inlined_call_operand.vmem [shape: bf16[8,8,96], index: 0, kind: input, shape index: {}]   ;;  %s703_s1 = inlined_call_operand.vmem [shape: bf16[96,64], index: 1, kind: input, shape index: {}]   ;;  %s704_s2 = inlined_call_operand.vmem [shape: bf16[32,128], index: 2, kind: input, shape index: {}]   ;;  %s705_s3 = inlined_call_operand.vmem [shape: f32[1,128], index: 3, kind: input, shape index: {}]   ;;  %s706_s4 = inlined_call_operand.hbm [shape: f32[8,128], index: 4, kind: output, shape index: {}]  }
   0x1   :  { %v509_v0 = vld [vmem:[%s703_s1] sm:$0xff]   ;;  %v510_v1 = vld [vmem:[%s703_s1 + $0x8] sm:$0xff]   ;;  %v511_v2 = vld [vmem:[%s703_s1 + $0x10] sm:$0xff]  }
   0x2   :  { %477 = vmatprep.subr.bf16.mxu0 %v509_v0  ;;  %v515_v3 = vld [vmem:[%s702_s0] sm:$0xff]   ;;  %v512_v4 = vld [vmem:[%s703_s1 + $0x18] sm:$0xff]  }
   0x3   :  { %478 = vmatpush3.bf16.msra.mxu0 %v509_v0  ;;  %489 = vmatprep.mubr.msk.bf16.mxu0 %vm95_vm0, %v515_v3 }
   0x4   :  { %479 = vmatprep.subr.bf16.mxu0 %v510_v1 }
   0x7   :  { %480 = vmatpush3.bf16.msra.mxu0 %v510_v1 }
   0x8   :  { %481 = vmatprep.subr.bf16.mxu0 %v511_v2 }
   0xb   :  { %482 = vmatpush3.bf16.msra.mxu0 %v511_v2 }
   0xc   :  { %9 = vsyncpa [#allocation3], 0  ;;  %483 = vmatprep.subr.bf16.mxu0 %v512_v4  ;;  %v513_v5 = vld [vmem:[%s703_s1 + $0x20] sm:$0xff]   ;;  %v514_v6 = vld [vmem:[%s703_s1 + $0x28] sm:$0xff]   ;;  %v578_v51 = vmov 0.0   ;;  %vm579_vm1 = vmmov 0  }
   0xd   :  { %v516_v7 = vld [vmem:[%s702_s0 + $0x8] sm:$0xff]   ;;  %v517_v8 = vld [vmem:[%s702_s0 + $0x10] sm:$0xff]   ;;  %v518_v9 = vld [vmem:[%s702_s0 + $0x18] sm:$0xff]   ;;  %s577_s0 = smov 96   ;;  %497 = vmatprep.subr.bf16.mxu1 %v578_v51  ;;  %501 = vmatprep.mubr.msk.bf16.mxu1 %vm579_vm1, %v578_v51  ;;  %vm261_vm2 = vcmask 261120   ;;  %vm353_vm3 = vcmask 1041409  }
   0xe   :  { %v519_v50 = vld [vmem:[%s704_s2] sm:$0xff]   ;;  %v520_v52 = vld [vmem:[%s704_s2 + $0x8] sm:$0xff]   ;;  %vm355_vm4 = vcmask 1042434   ;;  %vm357_vm5 = vcmask 1043459   ;;  %vm359_vm6 = vcmask 1044484   ;;  %vm361_vm7 = vcmask 1045509  }
   0xf   :  { %484 = vmatpush3.bf16.msra.mxu0 %v512_v4  ;;  %498 = vmatpush3.bf16.msra.mxu1 %v519_v50  ;;  %vm363_vm8 = vcmask 1046534   ;;  %vm365_vm9 = vcmask 1047559   ;;  %s580_s13 = smov [#allocation2]  }
  0x10   :  { %485 = vmatprep.subr.bf16.mxu0 %v513_v5  ;;  %499 = vmatprep.subr.bf16.mxu1 %v578_v51  ;;  %s430_s14 = sshll.u32 %s580_s13, 4  ;;  %s431_s14 = int_to_ptr.vmem [resolvable:$true] %s430_s14 }
  0x11   :  { %s553_s15 = scalar_lea.vmem %s431_s14, 128  ;;  %p558_p1 = scmp.lt.s32.totalorder %s431_s14, %s431_s14 }
  0x12   :  { %p554_p0 = scmp.ne.s32.totalorder %s431_s14, %s553_s15  ;;  %p559_p2 = scmp.lt.s32.totalorder %s553_s15, %s553_s15 }
  0x13   :  { %486 = vmatpush3.bf16.msra.mxu0 %v513_v5  ;;  %500 = vmatpush3.bf16.msra.mxu1 %v520_v52 }
  0x14   :  { %487 = vmatprep.subr.bf16.mxu0 %v514_v6  ;;  %p560_p3 = por %p559_p2, %p558_p1 }
  0x16   :  { %p561_p4 = pnand %p560_p3, %p554_p0 }
  0x17   :  { %488 = vmatpush3.bf16.msra.mxu0 %v514_v6 }
  0x1a   :  { %490 = vmatmul.mubr.msk.bf16.vlgmr.msra.gmra.mrb[0].mxu0 %vm95_vm0, %v516_v7 }
  0x1b   :  { %493 = vmatprep.mubr.msk.bf16.mxu0 %vm95_vm0, %v517_v8 }
  0x22   :  { %494 = vmatmul.mubr.msk.bf16.gmra.mrb[4].mxu0 %vm95_vm0, %v518_v9 }
  0xed   :  { %v640_v10 = vpop.f32.mrb[0].mxu0 }
  0xee   :  { %v454_v11 = vmul.f32 -1.442695, %v640_v10  ;;  %v643_v12 = vpop.f32.mrb[1].mxu0 }
  0xef   :  { %v452_v13 = vmul.f32 -1.442695, %v643_v12  ;;  %v646_v14 = vpop.f32.mrb[2].mxu0 }
  0xf0   :  { %521 = vpow2.f32 %v454_v11  ;;  %v455_v15 = vmul.f32 -1.442695, %v646_v14  ;;  %v649_v16 = vpop.f32.mrb[3].mxu0 }
  0xf1   :  { %523 = vpow2.f32 %v452_v13  ;;  %v453_v17 = vmul.f32 -1.442695, %v649_v16 }
  0xf2   :  { %525 = vpow2.f32 %v455_v15 }
  0xf3   :  { %527 = vpow2.f32 %v453_v17 }
  0xf5   :  { %v652_v18 = vpop.f32.mrb[4].mxu0 }
  0xf6   :  { %v458_v19 = vmul.f32 -1.442695, %v652_v18  ;;  %v655_v20 = vpop.f32.mrb[5].mxu0 }
  0xf7   :  { %v456_v21 = vmul.f32 -1.442695, %v655_v20  ;;  %v658_v22 = vpop.f32.mrb[6].mxu0 }
  0xf8   :  { %529 = vpow2.f32 %v458_v19  ;;  %v459_v23 = vmul.f32 -1.442695, %v658_v22  ;;  %v661_v24 = vpop.f32.mrb[7].mxu0 }
  0xf9   :  { %531 = vpow2.f32 %v456_v21  ;;  %v457_v25 = vmul.f32 -1.442695, %v661_v24 }
  0xfa   :  { %v522_v26 = vpop.eup %521  ;;  %533 = vpow2.f32 %v459_v23 }
  0xfb   :  { %v524_v27 = vpop.eup %523  ;;  %v199_v28 = vadd.f32 1.0, %v522_v26  ;;  %535 = vpow2.f32 %v457_v25 }
  0xfc   :  { %v526_v29 = vpop.eup %525  ;;  %v197_v30 = vadd.f32 1.0, %v524_v27 }
  0xfd   :  { %v528_v31 = vpop.eup %527  ;;  %537 = vrcp.f32 %v199_v28  ;;  %v200_v32 = vadd.f32 1.0, %v526_v29 }
  0xfe   :  { %539 = vrcp.f32 %v197_v30  ;;  %v198_v33 = vadd.f32 1.0, %v528_v31 }
  0xff   :  { %541 = vrcp.f32 %v200_v32 }
 0x100   :  { %543 = vrcp.f32 %v198_v33 }
 0x102   :  { %v530_v34 = vpop.eup %529 }
 0x103   :  { %v532_v35 = vpop.eup %531  ;;  %v203_v39 = vadd.f32 1.0, %v530_v34 }
 0x104   :  { %v534_v36 = vpop.eup %533  ;;  %v201_v37 = vadd.f32 1.0, %v532_v35 }
 0x105   :  { %v536_v38 = vpop.eup %535  ;;  %v204_v43 = vadd.f32 1.0, %v534_v36 }
 0x106   :  { %545 = vrcp.f32 %v201_v37  ;;  %v202_v40 = vadd.f32 1.0, %v536_v38 }
 0x107   :  { %v538_v41 = vpop.eup %537 }
 0x108   :  { %v540_v42 = vpop.eup %539  ;;  %547 = vrcp.f32 %v202_v40  ;;  %233 = vrot.lane.b32.xlu1 %v538_v41, %s577_s0 }
 0x109   :  { %229 = vrot.lane.b32.xlu0 %v540_v42, %s577_s0  ;;  %549 = vrcp.f32 %v203_v39  ;;  %v542_v44 = vpop.eup %541 }
 0x10a   :  { %v544_v45 = vpop.eup %543  ;;  %551 = vrcp.f32 %v204_v43 }
 0x10c   :  { %235 = vrot.lane.b32.xlu1 %v542_v44, %s577_s0 }
 0x10d   :  { %231 = vrot.lane.b32.xlu0 %v544_v45, %s577_s0 }
 0x110   :  { %v546_v46 = vpop.eup %545 }
 0x111   :  { %237 = vrot.lane.b32.xlu0 %v546_v46, %s577_s0 }
 0x112   :  { %v548_v47 = vpop.eup %547 }
 0x113   :  { %239 = vrot.lane.b32.xlu1 %v548_v47, %s577_s0  ;;  %v550_v48 = vpop.eup %549 }
 0x114   :  { %v552_v49 = vpop.eup %551 }
 0x115   :  { %241 = vrot.lane.b32.xlu0 %v550_v48, %s577_s0 }
 0x117   :  { %243 = vrot.lane.b32.xlu1 %v552_v49, %s577_s0 }
 0x17a   :  { %v234_v53 = vpop.permute.xlu1 %233 }
 0x17b   :  { %v255_v54 = vmul.f32 %v640_v10, %v234_v53  ;;  %v230_v55 = vpop.permute.xlu0 %229 }
 0x17c   :  { %v253_v56 = vmul.f32 %v230_v55, %v643_v12 }
 0x17d   :  { %v276_v57 = vsel %vm261_vm2, %v255_v54, -inf }
 0x17e   :  { %v277_v58 = vrot.slane %v276_v57, 4  ;;  %v262_v59 = vsel %vm261_vm2, %v253_v56, -inf  ;;  %v236_v60 = vpop.permute.xlu1 %235 }
 0x17f   :  { %v263_v61 = vrot.slane %v262_v59, 4  ;;  %v256_v62 = vmul.f32 %v646_v14, %v236_v60  ;;  %v232_v63 = vpop.permute.xlu0 %231 }
 0x180   :  { %v278_v0 = vmax.f32 %v276_v57, %v277_v58  ;;  %v254_v1 = vmul.f32 %v232_v63, %v649_v16 }
 0x181   :  { %v264_v2 = vmax.f32 %v262_v59, %v263_v61  ;;  %v283_v3 = vsel %vm261_vm2, %v256_v62, -inf }
 0x182   :  { %v279_v4 = vrot.slane %v278_v0, 2  ;;  %v284_v5 = vrot.slane %v283_v3, 4  ;;  %v269_v6 = vsel %vm261_vm2, %v254_v1, -inf }
 0x183   :  { %v265_v7 = vrot.slane %v264_v2, 2  ;;  %v270_v8 = vrot.slane %v269_v6, 4  ;;  %v238_v9 = vpop.permute.xlu0 %237 }
 0x184   :  { %v280_v10 = vmax.f32 %v278_v0, %v279_v4  ;;  %v285_v11 = vmax.f32 %v283_v3, %v284_v5  ;;  %v257_v12 = vmul.f32 %v238_v9, %v655_v20 }
 0x185   :  { %v266_v13 = vmax.f32 %v264_v2, %v265_v7  ;;  %v271_v14 = vmax.f32 %v269_v6, %v270_v8  ;;  %v240_v15 = vpop.permute.xlu1 %239 }
 0x186   :  { %v281_v17 = vrot.slane %v280_v10, 1  ;;  %v286_v19 = vrot.slane %v285_v11, 2  ;;  %v290_v16 = vsel %vm261_vm2, %v257_v12, -inf  ;;  %v258_v21 = vmul.f32 %v240_v15, %v661_v24 }
 0x187   :  { %v267_v23 = vrot.slane %v266_v13, 1  ;;  %v272_v25 = vrot.slane %v271_v14, 2  ;;  %v291_v26 = vrot.slane %v290_v16, 4  ;;  %v242_v27 = vpop.permute.xlu0 %241 }
 0x188   :  { %v287_v28 = vmax.f32 %v285_v11, %v286_v19  ;;  %v297_v29 = vsel %vm261_vm2, %v258_v21, -inf  ;;  %v259_v30 = vmul.f32 %v652_v18, %v242_v27  ;;  %v282_v35 = vmax.f32 %v280_v10, %v281_v17 }
 0x189   :  { %v268_v31 = vmax.f32 %v266_v13, %v267_v23  ;;  %v273_v20 = vmax.f32 %v271_v14, %v272_v25  ;;  %v292_v32 = vmax.f32 %v290_v16, %v291_v26  ;;  %v298_v33 = vrot.slane %v297_v29, 4  ;;  %v244_v34 = vpop.permute.xlu1 %243  ;;  %v460_v25 = vld [vmem:[%s705_s3] ss:$0 sm:$0xff] }
 0x18a   :  { %v288_v36 = vrot.slane %v287_v28, 1  ;;  %v304_v37 = vsel %vm261_vm2, %v259_v30, -inf  ;;  %v260_v24 = vmul.f32 %v658_v22, %v244_v34  ;;  %v320_v47 = vpack.c.bf16 %v282_v35, %v282_v35 }
 0x18b   :  { %v274_v38 = vrot.slane %v273_v20, 1  ;;  %v293_v39 = vrot.slane %v292_v32, 2  ;;  %v299_v40 = vmax.f32 %v297_v29, %v298_v33  ;;  %v305_v42 = vrot.slane %v304_v37, 4 }
 0x18c   :  { %v289_v41 = vmax.f32 %v287_v28, %v288_v36  ;;  %v311_v43 = vsel %vm261_vm2, %v260_v24, -inf  ;;  %v318_v44 = vpack.c.bf16 %v268_v31, %v268_v31  ;;  %v347_v59 = vunpack.c.l.b16 %v320_v47 }
 0x18d   :  { %v275_v18 = vmax.f32 %v273_v20, %v274_v38  ;;  %v294_v45 = vmax.f32 %v292_v32, %v293_v39  ;;  %v300_v46 = vrot.slane %v299_v40, 2  ;;  %v306_v48 = vmax.f32 %v304_v37, %v305_v42 }
 0x18e   :  { %v312_v49 = vrot.slane %v311_v43, 4  ;;  %v321_v50 = vpack.c.bf16 %v289_v41, %v289_v41  ;;  %v345_v55 = vunpack.c.l.b16 %v318_v44 }
 0x18f   :  { %v319_v51 = vpack.c.bf16 %v275_v18, %v275_v18  ;;  %v295_v52 = vrot.slane %v294_v45, 1  ;;  %v301_v53 = vmax.f32 %v299_v40, %v300_v46  ;;  %v307_v22 = vrot.slane %v306_v48, 2 }
 0x190   :  { %v313_v54 = vmax.f32 %v311_v43, %v312_v49  ;;  %v348_v62 = vunpack.c.l.b16 %v321_v50 }
 0x191   :  { %v346_v56 = vunpack.c.l.b16 %v319_v51  ;;  %v296_v57 = vmax.f32 %v294_v45, %v295_v52  ;;  %v302_v58 = vrot.slane %v301_v53, 1  ;;  %v308_v60 = vmax.f32 %v306_v48, %v307_v22 }
 0x192   :  { %v314_v61 = vrot.slane %v313_v54, 2 }
 0x193   :  { %v354_v63 = vsel %vm353_vm3, %v346_v56, %v345_v55  ;;  %v322_v0 = vpack.c.bf16 %v296_v57, %v296_v57  ;;  %v303_v1 = vmax.f32 %v301_v53, %v302_v58  ;;  %v309_v3 = vrot.slane %v308_v60, 1 }
 0x194   :  { %v356_v2 = vsel %vm355_vm4, %v347_v59, %v354_v63  ;;  %v315_v4 = vmax.f32 %v313_v54, %v314_v61 }
 0x195   :  { %v358_v5 = vsel %vm357_vm5, %v348_v62, %v356_v2  ;;  %v349_v6 = vunpack.c.l.b16 %v322_v0  ;;  %v323_v7 = vpack.c.bf16 %v303_v1, %v303_v1  ;;  %v310_v8 = vmax.f32 %v308_v60, %v309_v3 }
 0x196   :  { %v316_v9 = vrot.slane %v315_v4, 1 }
 0x197   :  { %v360_v10 = vsel %vm359_vm6, %v349_v6, %v358_v5  ;;  %v350_v11 = vunpack.c.l.b16 %v323_v7  ;;  %v324_v12 = vpack.c.bf16 %v310_v8, %v310_v8 }
 0x198   :  { %v317_v13 = vmax.f32 %v315_v4, %v316_v9 }
 0x199   :  { %v362_v14 = vsel %vm361_vm7, %v350_v11, %v360_v10  ;;  %v351_v15 = vunpack.c.l.b16 %v324_v12 }
 0x19a   :  { %v325_v17 = vpack.c.bf16 %v317_v13, %v317_v13 }
 0x19b   :  { %v364_v16 = vsel %vm363_vm8, %v351_v15, %v362_v14 }
 0x19c   :  { %v352_v19 = vunpack.c.l.b16 %v325_v17 }
 0x19e   :  { %v366_v21 = vsel %vm365_vm9, %v352_v19, %v364_v16 }
 0x19f   :  { %v367_v23 = vpack.c.b16 %v366_v21, %v366_v21 }
 0x1a1   :  { %502 = vmatmul.mubr.msk.bf16.vlgmr.msra.gmra.mrb[0].mxu1 %vm261_vm2, %v367_v23 }
 0x274   :  { %v417_v26 = vpop.f32.mrb[0].mxu1 }
 0x275   :  { %v418_v27 = vadd.f32 %v460_v25, %v417_v26  ;;  %v503_v28 = vpop.f32.mrb[1].mxu1 }
 0x276   :  { %v420_v29 = vpop.f32.mrb[2].mxu1 }
 0x277   :  { %423 = vst [vmem:[#allocation2] sm:$0xff] %v418_v27  ;;  %v504_v30 = vpop.f32.mrb[3].mxu1 }
 0x278   :  { %564 = shalt.err (!%p561_p4)
}
 0x279   :  { %s565_s3 = scalar_lea.hbm %s706_s4, 128 }
 0x27a   :  { %p566_p5 = scmp.ne.s32.totalorder %s706_s4, %s565_s3  ;;  %p569_p6 = scmp.lt.u32.totalorder %s565_s3, %s706_s4 }
 0x27c   :  { %p571_p7 = pnand %p569_p6, %p566_p5 }
 0x27e   :  { %574 = shalt.err (!%p571_p7)
}
 0x27f   :  { %433 = dma.vmem_to_hbm [thread:$0]  %s431_s14, 128, %s706_s4, [#allocation3]  }
 0x280   :  { %575 = dma.done.wait [#allocation3], 128  }
 0x281   :  { %576 = vsyncadd [#allocation3], 4294967168 }
 0x282   :  { %437 = vsyncpa [#allocation3], 1 }

</bundles_post_ra>
